<compile_context>
chip_gen: v5e
topology: v5e:2x2
jax: 0.10.0
libtpu: 0.0.40
codegen_flags: <defaults>
</compile_context>

<pallas_src>
import functools
import math

import jax
import jax.numpy as jnp
from jax.experimental import pallas as pl
from jax.experimental.pallas import tpu as pltpu


# ---------------------------------------------------------------------------
# Kernel
# ---------------------------------------------------------------------------
def _mlp_kernel(x_ref,                 # (tm, D)      bf16
                wgu_ref,               # (D, 2*th)    bf16   [gate_j | up_j]
                bgu_ref,               # (2r, 2*th)   bf16   blockdiag(Bg_j, Bu_j), scaled
                agu_ref,               # (D, 2r)      bf16   [Ag | Au]
                wd_ref,                # (th, D)      bf16   down base tile
                ad_ref,                # (th, r)      bf16   down LoRA-A tile
                bd_ref,                # (r, D)       bf16   down LoRA-B, scaled
                o_ref,                 # (tm, D)      bf16
                acc_ref,               # (tm, D)      f32 scratch (down base acc)
                lad_ref,               # (tm, r)      f32 scratch (down LoRA-A acc)
                lagu_ref,              # (tm, 2r)     bf16 scratch (x @ [Ag|Au])
                *, th):
    j = pl.program_id(1)
    nj = pl.num_programs(1)

    x = x_ref[...]                     # bf16 straight to the MXU

    @pl.when(j == 0)
    def _init():
        # LoRA-A for gate|up: compute once per token tile, reuse over hidden tiles.
        lagu_ref[...] = jnp.dot(
            x, agu_ref[...], preferred_element_type=jnp.float32
        ).astype(lagu_ref.dtype)
        acc_ref[...] = jnp.zeros_like(acc_ref)
        lad_ref[...] = jnp.zeros_like(lad_ref)

    # Fused gate|up base projection for this hidden tile: (tm, D) @ (D, 2*th).
    gu = jnp.dot(x, wgu_ref[...], preferred_element_type=jnp.float32)
    # Fused gate|up LoRA-B (block-diagonal, scaling pre-folded): (tm, 2r) @ (2r, 2*th).
    gu = gu + jnp.dot(lagu_ref[...], bgu_ref[...],
                      preferred_element_type=jnp.float32)

    g = gu[:, :th]
    u = gu[:, th:]
    # SwiGLU in f32: sigmoid goes to the EUP, mul on the VPU; single bf16 cast.
    h = (g * jax.nn.sigmoid(g) * u).astype(jnp.bfloat16)      # (tm, th)

    # Down projection: accumulate base and LoRA-A partial sums across hidden tiles.
    acc_ref[...] += jnp.dot(h, wd_ref[...], preferred_element_type=jnp.float32)
    lad_ref[...] += jnp.dot(h, ad_ref[...], preferred_element_type=jnp.float32)

    @pl.when(j == nj - 1)
    def _finalize():
        lora_d = jnp.dot(lad_ref[...].astype(jnp.bfloat16), bd_ref[...],
                         preferred_element_type=jnp.float32)
        o_ref[...] = (acc_ref[...] + lora_d).astype(o_ref.dtype)


# ---------------------------------------------------------------------------
# Device-dependent tiling / VMEM heuristics
# ---------------------------------------------------------------------------
def _device_kind():
    try:
        return jax.devices()[0].device_kind.lower()
    except Exception:
        return ""


def _auto_hidden_tile(H):
    """Hidden tile: largest multiple of 128 dividing H, capped per generation
    (v7x has 64 MiB VMEM vs 128 MiB on v5e/v6e -> halve the cap)."""
    kind = _device_kind()
    max_th = 1024 if "v7" in kind else 2048
    if H <= max_th:
        return H
    best = None
    for c in range(128, max_th + 1, 128):
        if H % c == 0:
            best = c
    return best if best is not None else H


def _auto_token_tile(T):
    """Token tile: 256..512 rows (128 granularity on v5e's 4x128 MXU, 256 on
    v6e/v7x's 2x256 MXU); small inputs fall back to the full T."""
    kind = _device_kind()
    base = 128 if "v5" in kind else 256
    if T <= base:
        return T
    best = None
    for t in range(base, min(T, 512) + 1, base):
        if T % t == 0:
            best = t
    if best is None:
        for t in range(min(T, 512), 7, -1):
            if T % t == 0 and t % 8 == 0:
                best = t
                break
    return best if best is not None else T


def _vmem_limit_bytes(tm, th, D, H, r):
    bpe = 2  # bf16
    per_step = (D * 2 * th          # wgu tile
                + 2 * r * 2 * th    # bgu tile
                + th * D            # wd tile
                + th * r            # ad tile
                + 2 * tm * D        # x tile + out tile
                ) * bpe
    const = (D * 2 * r + r * D) * bpe                   # agu, bd (constant blocks)
    scratch = tm * D * 4 + tm * r * 4 + tm * 2 * r * 2  # acc, lad, lagu
    est = 2 * (per_step + const) + scratch              # double buffering
    kind = _device_kind()
    if "v5" in kind or "v6" in kind:
        cap = 100 << 20          # 128 MiB physical
    elif "v7" in kind:
        cap = 48 << 20           # 64 MiB physical
    else:
        cap = 32 << 20           # conservative for unknown parts
    return int(min(max(2 * est, 16 << 20), cap))


# ---------------------------------------------------------------------------
# One-time weight preparation (hoisted out of the forward path)
# ---------------------------------------------------------------------------
def prepare_mlp_weights(params, *, alpha=16, rank=16, hidden_tile=None):
    """Transpose PyTorch (out, in) weights to (in, out), fold the LoRA scaling
    into the B matrices, and fuse gate|up per hidden tile. Call once per model,
    not per forward."""
    H, D = params["gate_w"].shape
    r = rank
    scaling = alpha / rank
    th = hidden_tile if hidden_tile is not None else _auto_hidden_tile(H)
    assert H % th == 0, (H, th)
    nj = H // th

    dt = params["gate_w"].dtype
    f32 = jnp.float32

    wg_t = params["gate_w"].T                                        # (D, H)
    wu_t = params["up_w"].T                                          # (D, H)
    ag_t = params["gate_a"].T                                        # (D, r)
    au_t = params["up_a"].T                                          # (D, r)
    bg_t = (params["gate_b"].astype(f32).T * scaling).astype(dt)     # (r, H)
    bu_t = (params["up_b"].astype(f32).T * scaling).astype(dt)       # (r, H)
    wd_t = params["down_w"].T                                        # (H, D)
    ad_t = params["down_a"].T                                        # (H, r)
    bd_t = (params["down_b"].astype(f32).T * scaling).astype(dt)     # (r, D)

    # Fused gate|up base weight, interleaved so column block j (width 2*th)
    # is [gate tile j | up tile j].
    wgu = jnp.stack([wg_t.reshape(D, nj, th), wu_t.reshape(D, nj, th)],
                    axis=2).reshape(D, 2 * H)
    # Fused gate|up LoRA-A: (D, 2r).
    agu = jnp.concatenate([ag_t, au_t], axis=1)
    # Fused gate|up LoRA-B, block-diagonal per hidden tile: block j is
    # [[Bg_j, 0], [0, Bu_j]] so (x@[Ag|Au]) @ block gives [lora_g | lora_u].
    z = jnp.zeros((r, nj, th), dt)
    bgu = jnp.concatenate(
        [jnp.stack([bg_t.reshape(r, nj, th), z], axis=2),
         jnp.stack([z, bu_t.reshape(r, nj, th)], axis=2)],
        axis=0).reshape(2 * r, 2 * H)

    weights = dict(wgu=wgu, bgu=bgu, agu=agu, wd=wd_t, ad=ad_t, bd=bd_t)
    return weights, th


# ---------------------------------------------------------------------------
# Forward
# ---------------------------------------------------------------------------
@functools.partial(jax.jit, static_argnames=("hidden_tile", "rank", "token_tile"))
def mlp_forward(x, weights, *, hidden_tile, rank, token_tile=None):
    """x: (B, S, D) bf16; weights: output of prepare_mlp_weights."""
    B, S, D = x.shape
    T = B * S
    H = weights["wd"].shape[0]
    r = rank
    th = hidden_tile
    assert H % th == 0, (H, th)
    tm = token_tile if token_tile is not None else _auto_token_tile(T)
    assert T % tm == 0, (T, tm)

    x2d = x.reshape(T, D)
    grid = (T // tm, H // th)          # tokens (parallel), hidden reduction (arbitrary, last)

    kernel = functools.partial(_mlp_kernel, th=th)

    out2d = pl.pallas_call(
        kernel,
        out_shape=jax.ShapeDtypeStruct((T, D), x.dtype),
        grid_spec=pltpu.PrefetchScalarGridSpec(
            num_scalar_prefetch=0,
            grid=grid,
            in_specs=[
                pl.BlockSpec((tm, D), lambda i, j: (i, 0)),          # x tile
                pl.BlockSpec((D, 2 * th), lambda i, j: (0, j)),      # fused gate|up W
                pl.BlockSpec((2 * r, 2 * th), lambda i, j: (0, j)),  # fused gate|up B
                pl.BlockSpec((D, 2 * r), lambda i, j: (0, 0)),       # fused gate|up A
                pl.BlockSpec((th, D), lambda i, j: (j, 0)),          # down W tile
                pl.BlockSpec((th, r), lambda i, j: (j, 0)),          # down A tile
                pl.BlockSpec((r, D), lambda i, j: (0, 0)),           # down B (scaled)
            ],
            out_specs=pl.BlockSpec((tm, D), lambda i, j: (i, 0)),
            scratch_shapes=[
                pltpu.VMEM((tm, D), jnp.float32),       # down base accumulator
                pltpu.VMEM((tm, r), jnp.float32),       # down LoRA-A accumulator
                pltpu.VMEM((tm, 2 * r), jnp.bfloat16),  # cached x @ [Ag|Au]
            ],
        ),
        compiler_params=pltpu.CompilerParams(
            dimension_semantics=("parallel", "arbitrary"),
            vmem_limit_bytes=_vmem_limit_bytes(tm, th, D, H, r),
        ),
    )(x2d, weights["wgu"], weights["bgu"], weights["agu"],
      weights["wd"], weights["ad"], weights["bd"])

    return out2d.reshape(B, S, D)


# ---------------------------------------------------------------------------
# Pure-JAX reference (f32 math, PyTorch-layout weights)
# ---------------------------------------------------------------------------
def _reference(x, params, *, alpha=16, rank=16):
    scaling = alpha / rank

    def lora_linear(inp, w, a, b):
        base = inp @ w.astype(jnp.float32).T
        return base + scaling * ((inp @ a.astype(jnp.float32).T)
                                 @ b.astype(jnp.float32).T)

    xf = x.astype(jnp.float32)
    g = lora_linear(xf, params["gate_w"], params["gate_a"], params["gate_b"])
    u = lora_linear(xf, params["up_w"], params["up_a"], params["up_b"])
    h = jax.nn.silu(g) * u
    out = lora_linear(h, params["down_w"], params["down_a"], params["down_b"])
    return out.astype(x.dtype)


def make_params(key, dim, hidden_dim, rank, dtype=jnp.bfloat16):
    """Deterministic synthetic init; PyTorch weight layout (out, in)."""
    ks = jax.random.split(key, 9)

    def w(k, shape, std):
        return (jax.random.normal(k, shape, jnp.float32) * std).astype(dtype)

    std_w = math.sqrt(2 / (5 * dim))
    std_l = 1.0 / math.sqrt(dim)
    return {
        "gate_w": w(ks[0], (hidden_dim, dim), std_w),
        "gate_a": w(ks[1], (rank, dim), std_l),
        "gate_b": w(ks[2], (hidden_dim, rank), std_l),
        "up_w":   w(ks[3], (hidden_dim, dim), std_w),
        "up_a":   w(ks[4], (rank, dim), std_l),
        "up_b":   w(ks[5], (hidden_dim, rank), std_l),
        "down_w": w(ks[6], (dim, hidden_dim), std_w),
        "down_a": w(ks[7], (rank, hidden_dim), std_l),
        "down_b": w(ks[8], (dim, rank), std_l),
    }


if __name__ == "__main__":
    # LLaMAConfig(dim=32, ...): hidden_dim = 256 * ceil((2*4*32/3)/256) = 256
    B, S, dim, rank, alpha = 2, 8, 32, 16, 16
    multiple_of = 256
    hd = int(2 * (4 * dim) / 3)
    hidden_dim = multiple_of * ((hd + multiple_of - 1) // multiple_of)

    key = jax.random.PRNGKey(0)
    kx, kp = jax.random.split(key)
    x = jax.random.normal(kx, (B, S, dim), jnp.float32).astype(jnp.bfloat16)
    params = make_params(kp, dim, hidden_dim, rank)

    # One-time weight prep (transposes / fusion / scaling folded in) — hoisted
    # out of the forward path.
    weights, th = prepare_mlp_weights(params, alpha=alpha, rank=rank)

    out = mlp_forward(x, weights, hidden_tile=th, rank=rank)
    out = jax.block_until_ready(out)

    ref = _reference(x, params, alpha=alpha, rank=rank)
    assert out.shape == (B, S, dim) and out.dtype == jnp.bfloat16
    err = jnp.max(jnp.abs(out.astype(jnp.float32) - ref.astype(jnp.float32)))
    assert float(err) < 5e-2, f"mismatch vs reference: {err}"

    print("KERNEL_OK")
</pallas_src>

<mosaic_0001>
module attributes {stable_mosaic.version = 11 : i64} {
  func.func @_mlp_kernel(%arg0: i32, %arg1: i32, %arg2: memref<16x32xbf16, #tpu.memory_space<vmem>>, %arg3: memref<32x512xbf16, #tpu.memory_space<vmem>>, %arg4: memref<32x512xbf16, #tpu.memory_space<vmem>>, %arg5: memref<32x32xbf16, #tpu.memory_space<vmem>>, %arg6: memref<256x32xbf16, #tpu.memory_space<vmem>>, %arg7: memref<256x16xbf16, #tpu.memory_space<vmem>>, %arg8: memref<16x32xbf16, #tpu.memory_space<vmem>>, %arg9: memref<16x32xbf16, #tpu.memory_space<vmem>>, %arg10: memref<16x32xf32, #tpu.memory_space<vmem>>, %arg11: memref<16x16xf32, #tpu.memory_space<vmem>>, %arg12: memref<16x32xbf16, #tpu.memory_space<vmem>>) attributes {dimension_semantics = [#tpu.dimension_semantics<parallel>, #tpu.dimension_semantics<arbitrary>], iteration_bounds = array<i64: 1, 1>, scalar_prefetch = 0 : i64, scratch_operands = 3 : i64, tpu.core_type = #tpu.core_type<tc>, window_params = [{transform_indices = @transform_0, window_bounds = array<i64: 16, 32>}, {transform_indices = @transform_1, window_bounds = array<i64: 32, 512>}, {transform_indices = @transform_2, window_bounds = array<i64: 32, 512>}, {pipeline_mode = #tpu.pipeline_mode<synchronous>, transform_indices = @transform_3, window_bounds = array<i64: 32, 32>}, {transform_indices = @transform_4, window_bounds = array<i64: 256, 32>}, {transform_indices = @transform_5, window_bounds = array<i64: 256, 16>}, {pipeline_mode = #tpu.pipeline_mode<synchronous>, transform_indices = @transform_6, window_bounds = array<i64: 16, 32>}, {transform_indices = @transform_7, window_bounds = array<i64: 16, 32>}]} {
    %c0 = arith.constant 0 : index
    %c0_0 = arith.constant 0 : index
    %0 = vector.load %arg2[%c0, %c0_0] : memref<16x32xbf16, #tpu.memory_space<vmem>>, vector<16x32xbf16>
    %c0_i32 = arith.constant 0 : i32
    %1 = arith.cmpi eq, %arg1, %c0_i32 : i32
    %2 = arith.extui %1 : i1 to i32
    %c0_i32_1 = arith.constant 0 : i32
    %3 = arith.cmpi ne, %2, %c0_i32_1 : i32
    scf.if %3 {
      %c0_26 = arith.constant 0 : index
      %c0_27 = arith.constant 0 : index
      %33 = vector.load %arg5[%c0_26, %c0_27] : memref<32x32xbf16, #tpu.memory_space<vmem>>, vector<32x32xbf16>
      %cst_28 = arith.constant dense<0.000000e+00> : vector<16x32xf32>
      %34 = tpu.matmul %0, %33, %cst_28 {dimension_numbers = #tpu.dot_dimension_numbers<[1], [0], [0], [1], [0, 0, 1, 1], [], []>} : vector<16x32xbf16>, vector<32x32xbf16>, vector<16x32xf32> -> vector<16x32xf32>
      %35 = arith.truncf %34 : vector<16x32xf32> to vector<16x32xbf16>
      %c0_29 = arith.constant 0 : index
      %c0_30 = arith.constant 0 : index
      %36 = vector.load %arg12[%c0_29, %c0_30] : memref<16x32xbf16, #tpu.memory_space<vmem>>, vector<16x32xbf16>
      tpu.vector_store %arg12[%c0_29, %c0_30], %35 {strides = array<i32>} : memref<16x32xbf16, #tpu.memory_space<vmem>>, vector<16x32xbf16>,
      %cst_31 = arith.constant 0.000000e+00 : f32
      %37 = vector.broadcast %cst_31 : f32 to vector<16x32xf32>
      %c0_32 = arith.constant 0 : index
      %c0_33 = arith.constant 0 : index
      %38 = vector.load %arg10[%c0_32, %c0_33] : memref<16x32xf32, #tpu.memory_space<vmem>>, vector<16x32xf32>
      tpu.vector_store %arg10[%c0_32, %c0_33], %37 {strides = array<i32>} : memref<16x32xf32, #tpu.memory_space<vmem>>, vector<16x32xf32>,
      %cst_34 = arith.constant 0.000000e+00 : f32
      %39 = vector.broadcast %cst_34 : f32 to vector<16x16xf32>
      %c0_35 = arith.constant 0 : index
      %c0_36 = arith.constant 0 : index
      %40 = vector.load %arg11[%c0_35, %c0_36] : memref<16x16xf32, #tpu.memory_space<vmem>>, vector<16x16xf32>
      tpu.vector_store %arg11[%c0_35, %c0_36], %39 {strides = array<i32>} : memref<16x16xf32, #tpu.memory_space<vmem>>, vector<16x16xf32>,
    } else {
    }
    %c0_2 = arith.constant 0 : index
    %c0_3 = arith.constant 0 : index
    %4 = vector.load %arg3[%c0_2, %c0_3] : memref<32x512xbf16, #tpu.memory_space<vmem>>, vector<32x512xbf16>
    %cst = arith.constant dense<0.000000e+00> : vector<16x512xf32>
    %5 = tpu.matmul %0, %4, %cst {dimension_numbers = #tpu.dot_dimension_numbers<[1], [0], [0], [1], [0, 0, 1, 1], [], []>} : vector<16x32xbf16>, vector<32x512xbf16>, vector<16x512xf32> -> vector<16x512xf32>
    %c0_4 = arith.constant 0 : index
    %c0_5 = arith.constant 0 : index
    %6 = vector.load %arg12[%c0_4, %c0_5] : memref<16x32xbf16, #tpu.memory_space<vmem>>, vector<16x32xbf16>
    %c0_6 = arith.constant 0 : index
    %c0_7 = arith.constant 0 : index
    %7 = vector.load %arg4[%c0_6, %c0_7] : memref<32x512xbf16, #tpu.memory_space<vmem>>, vector<32x512xbf16>
    %cst_8 = arith.constant dense<0.000000e+00> : vector<16x512xf32>
    %8 = tpu.matmul %6, %7, %cst_8 {dimension_numbers = #tpu.dot_dimension_numbers<[1], [0], [0], [1], [0, 0, 1, 1], [], []>} : vector<16x32xbf16>, vector<32x512xbf16>, vector<16x512xf32> -> vector<16x512xf32>
    %9 = arith.addf %5, %8 : vector<16x512xf32>
    %10 = vector.extract_strided_slice %9 {offsets = [0, 0], sizes = [16, 256], strides = [1, 1]} : vector<16x512xf32> to vector<16x256xf32>
    %11 = vector.extract_strided_slice %9 {offsets = [0, 256], sizes = [16, 256], strides = [1, 1]} : vector<16x512xf32> to vector<16x256xf32>
    %12 = arith.negf %10 : vector<16x256xf32>
    %13 = math.exp %12 : vector<16x256xf32>
    %cst_9 = arith.constant 1.000000e+00 : f32
    %14 = vector.broadcast %cst_9 : f32 to vector<16x256xf32>
    %15 = arith.addf %14, %13 : vector<16x256xf32>
    %16 = arith.divf %14, %15 : vector<16x256xf32>
    %17 = arith.mulf %10, %16 : vector<16x256xf32>
    %18 = arith.mulf %17, %11 : vector<16x256xf32>
    %19 = arith.truncf %18 : vector<16x256xf32> to vector<16x256xbf16>
    %c0_10 = arith.constant 0 : index
    %c0_11 = arith.constant 0 : index
    %20 = vector.load %arg10[%c0_10, %c0_11] : memref<16x32xf32, #tpu.memory_space<vmem>>, vector<16x32xf32>
    %c0_12 = arith.constant 0 : index
    %c0_13 = arith.constant 0 : index
    %21 = vector.load %arg6[%c0_12, %c0_13] : memref<256x32xbf16, #tpu.memory_space<vmem>>, vector<256x32xbf16>
    %cst_14 = arith.constant dense<0.000000e+00> : vector<16x32xf32>
    %22 = tpu.matmul %19, %21, %cst_14 {dimension_numbers = #tpu.dot_dimension_numbers<[1], [0], [0], [1], [0, 0, 1, 1], [], []>} : vector<16x256xbf16>, vector<256x32xbf16>, vector<16x32xf32> -> vector<16x32xf32>
    %23 = arith.addf %20, %22 : vector<16x32xf32>
    %c0_15 = arith.constant 0 : index
    %c0_16 = arith.constant 0 : index
    %24 = vector.load %arg10[%c0_15, %c0_16] : memref<16x32xf32, #tpu.memory_space<vmem>>, vector<16x32xf32>
    tpu.vector_store %arg10[%c0_15, %c0_16], %23 {strides = array<i32>} : memref<16x32xf32, #tpu.memory_space<vmem>>, vector<16x32xf32>,
    %c0_17 = arith.constant 0 : index
    %c0_18 = arith.constant 0 : index
    %25 = vector.load %arg11[%c0_17, %c0_18] : memref<16x16xf32, #tpu.memory_space<vmem>>, vector<16x16xf32>
    %c0_19 = arith.constant 0 : index
    %c0_20 = arith.constant 0 : index
    %26 = vector.load %arg7[%c0_19, %c0_20] : memref<256x16xbf16, #tpu.memory_space<vmem>>, vector<256x16xbf16>
    %cst_21 = arith.constant dense<0.000000e+00> : vector<16x16xf32>
    %27 = tpu.matmul %19, %26, %cst_21 {dimension_numbers = #tpu.dot_dimension_numbers<[1], [0], [0], [1], [0, 0, 1, 1], [], []>} : vector<16x256xbf16>, vector<256x16xbf16>, vector<16x16xf32> -> vector<16x16xf32>
    %28 = arith.addf %25, %27 : vector<16x16xf32>
    %c0_22 = arith.constant 0 : index
    %c0_23 = arith.constant 0 : index
    %29 = vector.load %arg11[%c0_22, %c0_23] : memref<16x16xf32, #tpu.memory_space<vmem>>, vector<16x16xf32>
    tpu.vector_store %arg11[%c0_22, %c0_23], %28 {strides = array<i32>} : memref<16x16xf32, #tpu.memory_space<vmem>>, vector<16x16xf32>,
    %c0_i32_24 = arith.constant 0 : i32
    %30 = arith.cmpi eq, %arg1, %c0_i32_24 : i32
    %31 = arith.extui %30 : i1 to i32
    %c0_i32_25 = arith.constant 0 : i32
    %32 = arith.cmpi ne, %31, %c0_i32_25 : i32
    scf.if %32 {
      %c0_26 = arith.constant 0 : index
      %c0_27 = arith.constant 0 : index
      %33 = vector.load %arg11[%c0_26, %c0_27] : memref<16x16xf32, #tpu.memory_space<vmem>>, vector<16x16xf32>
      %34 = arith.truncf %33 : vector<16x16xf32> to vector<16x16xbf16>
      %c0_28 = arith.constant 0 : index
      %c0_29 = arith.constant 0 : index
      %35 = vector.load %arg8[%c0_28, %c0_29] : memref<16x32xbf16, #tpu.memory_space<vmem>>, vector<16x32xbf16>
      %cst_30 = arith.constant dense<0.000000e+00> : vector<16x32xf32>
      %36 = tpu.matmul %34, %35, %cst_30 {dimension_numbers = #tpu.dot_dimension_numbers<[1], [0], [0], [1], [0, 0, 1, 1], [], []>} : vector<16x16xbf16>, vector<16x32xbf16>, vector<16x32xf32> -> vector<16x32xf32>
      %c0_31 = arith.constant 0 : index
      %c0_32 = arith.constant 0 : index
      %37 = vector.load %arg10[%c0_31, %c0_32] : memref<16x32xf32, #tpu.memory_space<vmem>>, vector<16x32xf32>
      %38 = arith.addf %37, %36 : vector<16x32xf32>
      %39 = arith.truncf %38 : vector<16x32xf32> to vector<16x32xbf16>
      %c0_33 = arith.constant 0 : index
      %c0_34 = arith.constant 0 : index
      %40 = vector.load %arg9[%c0_33, %c0_34] : memref<16x32xbf16, #tpu.memory_space<vmem>>, vector<16x32xbf16>
      tpu.vector_store %arg9[%c0_33, %c0_34], %39 {strides = array<i32>} : memref<16x32xbf16, #tpu.memory_space<vmem>>, vector<16x32xbf16>,
    } else {
    }
    return
  }
  func.func @transform_0(%arg0: i32, %arg1: i32) -> (i32, i32) {
    %c0_i32 = arith.constant 0 : i32
    %c0_i32_0 = arith.constant 0 : i32
    return %arg0, %c0_i32 : i32, i32
  }
  func.func @transform_1(%arg0: i32, %arg1: i32) -> (i32, i32) {
    %c0_i32 = arith.constant 0 : i32
    %c0_i32_0 = arith.constant 0 : i32
    return %c0_i32, %arg1 : i32, i32
  }
  func.func @transform_2(%arg0: i32, %arg1: i32) -> (i32, i32) {
    %c0_i32 = arith.constant 0 : i32
    %c0_i32_0 = arith.constant 0 : i32
    return %c0_i32, %arg1 : i32, i32
  }
  func.func @transform_3(%arg0: i32, %arg1: i32) -> (i32, i32) {
    %c0_i32 = arith.constant 0 : i32
    %c0_i32_0 = arith.constant 0 : i32
    %c0_i32_1 = arith.constant 0 : i32
    return %c0_i32, %c0_i32_0 : i32, i32
  }
  func.func @transform_4(%arg0: i32, %arg1: i32) -> (i32, i32) {
    %c0_i32 = arith.constant 0 : i32
    %c0_i32_0 = arith.constant 0 : i32
    return %arg1, %c0_i32 : i32, i32
  }
  func.func @transform_5(%arg0: i32, %arg1: i32) -> (i32, i32) {
    %c0_i32 = arith.constant 0 : i32
    %c0_i32_0 = arith.constant 0 : i32
    return %arg1, %c0_i32 : i32, i32
  }
  func.func @transform_6(%arg0: i32, %arg1: i32) -> (i32, i32) {
    %c0_i32 = arith.constant 0 : i32
    %c0_i32_0 = arith.constant 0 : i32
    %c0_i32_1 = arith.constant 0 : i32
    return %c0_i32, %c0_i32_0 : i32, i32
  }
  func.func @transform_7(%arg0: i32, %arg1: i32) -> (i32, i32) {
    %c0_i32 = arith.constant 0 : i32
    %c0_i32_0 = arith.constant 0 : i32
    return %arg0, %c0_i32 : i32, i32
  }
}

</mosaic_0001>

<bundles_post_ra>
// kernel: mlp_forward.1
= control target key start
LH: loop header
LB: loop body
LE: loop exit
PB: predicated region body
PF: predicated region fallthrough
CT: control target
= control target key end

     0   :  { %s1438_s0 = inlined_call_operand.vmem [shape: bf16[16,32], index: 0, kind: input, shape index: {}]   ;;  %s1439_s1 = inlined_call_operand.vmem [shape: bf16[32,512], index: 1, kind: input, shape index: {}]   ;;  %s1440_s2 = inlined_call_operand.vmem [shape: bf16[32,512], index: 2, kind: input, shape index: {}]   ;;  %s1441_s3 = inlined_call_operand.vmem [shape: bf16[32,32], index: 3, kind: input, shape index: {}]   ;;  %s1442_s4 = inlined_call_operand.vmem [shape: bf16[256,32], index: 4, kind: input, shape index: {}]   ;;  %s1443_s5 = inlined_call_operand.vmem [shape: bf16[256,16], index: 5, kind: input, shape index: {}]   ;;  %s1444_s6 = inlined_call_operand.vmem [shape: bf16[16,32], index: 6, kind: input, shape index: {}]   ;;  %s1445_s7 = inlined_call_operand.hbm [shape: bf16[16,32], index: 7, kind: output, shape index: {}]  }
   0x1   :  { %v1012_v0 = vld [vmem:[%s1441_s3 + $0x8] sm:$0xff] }
   0x2   :  { %12 = vsyncpa [#allocation6], 0  ;;  %65 = vmatpush.bf16.msra.mxu0 %v1012_v0  ;;  %v1011_v1 = vld [vmem:[%s1441_s3] sm:$0xff]  ;;  %vm55_vm0 = vcmask 261120   ;;  %v1028_v4 = vld [vmem:[%s1440_s2 + $0x2c] sm:$0xf0] }
   0x3   :  { %v1010_v2 = vld [vmem:[%s1438_s0] sm:$0xff]  ;;  %v816_v7 = vld [vmem:[%s1440_s2 + $0x30] sm:$0xf0]  ;;  %v822_v8 = vld [vmem:[%s1440_s2 + $0x28] sm:$0xf]  ;;  %vm75_vm1 = vcmask 257024  }
   0x4   :  { %v814_v3 = vld [vmem:[%s1440_s2 + $0x20] sm:$0xf]  ;;  %v1026_v5 = vld [vmem:[%s1440_s2 + $0x24] sm:$0xf]  ;;  %v1029_v9 = vld [vmem:[%s1440_s2 + $0x34] sm:$0xf0] }
   0x5   :  { %v815_v6 = vor.u32 %v1028_v4, %v814_v3  ;;  %v819_v10 = vor.u32 %v1026_v5, %v816_v7  ;;  %v823_v11 = vor.u32 %v1029_v9, %v822_v8  ;;  %v1027_v12 = vld [vmem:[%s1440_s2 + $0x2c] sm:$0xf]  ;;  %v824_v13 = vld [vmem:[%s1440_s2 + $0x38] sm:$0xf0]  ;;  %v798_v14 = vld [vmem:[%s1440_s2] sm:$0xf] }
   0x6   :  { %66 = vmatpush.bf16.msra.mxu0 %v1011_v1  ;;  %v827_v15 = vor.u32 %v1027_v12, %v824_v13  ;;  %v1024_v16 = vld [vmem:[%s1440_s2 + $0xc] sm:$0xf0]  ;;  %v1022_v17 = vld [vmem:[%s1440_s2 + $0x4] sm:$0xf]  ;;  %v800_v18 = vld [vmem:[%s1440_s2 + $0x10] sm:$0xf0] }
   0x7   :  { %156 = vmatpush.bf16.msra.mxu1 %v815_v6  ;;  %170 = vmatpush.bf16.msra.mxu2 %v819_v10  ;;  %v799_v19 = vor.u32 %v1024_v16, %v798_v14  ;;  %v803_v20 = vor.u32 %v1022_v17, %v800_v18  ;;  %v806_v21 = vld [vmem:[%s1440_s2 + $0x8] sm:$0xf]  ;;  %v1025_v22 = vld [vmem:[%s1440_s2 + $0x14] sm:$0xf0]  ;;  %v1023_v23 = vld [vmem:[%s1440_s2 + $0xc] sm:$0xf] }
   0x8   :  { %184 = vmatpush.bf16.msra.mxu3 %v823_v11  ;;  %v807_v24 = vor.u32 %v1025_v22, %v806_v21  ;;  %v808_v25 = vld [vmem:[%s1440_s2 + $0x18] sm:$0xf0]  ;;  %v854_v27 = vld [vmem:[%s1439_s1 + $0x20] sm:$0xf]  ;;  %v1019_v28 = vld [vmem:[%s1439_s1 + $0x2c] sm:$0xf0] }
   0x9   :  { %791 = vmatmul.msk.bf16.vlgmr.msra.gmra.mxu0 %vm55_vm0, %v1010_v2  ;;  %v811_v26 = vor.u32 %v1023_v23, %v808_v25  ;;  %v1017_v29 = vld [vmem:[%s1439_s1 + $0x24] sm:$0xf]  ;;  %v855_v30 = vor.u32 %v1019_v28, %v854_v27  ;;  %v856_v31 = vld [vmem:[%s1439_s1 + $0x30] sm:$0xf0]  ;;  %v838_v32 = vld [vmem:[%s1439_s1] sm:$0xf] }
   0xa   :  { %198 = vmatpush.bf16.msrb.mxu0 %v827_v15  ;;  %v1015_v33 = vld [vmem:[%s1439_s1 + $0xc] sm:$0xf0]  ;;  %v859_v34 = vor.u32 %v1017_v29, %v856_v31  ;;  %v1013_v35 = vld [vmem:[%s1439_s1 + $0x4] sm:$0xf]  ;;  %v840_v36 = vld [vmem:[%s1439_s1 + $0x10] sm:$0xf0] }
   0xb   :  { %157 = vmatpush.bf16.msra.mxu1 %v799_v19  ;;  %171 = vmatpush.bf16.msra.mxu2 %v803_v20  ;;  %v862_v37 = vld [vmem:[%s1439_s1 + $0x28] sm:$0xf]  ;;  %v839_v38 = vor.u32 %v1015_v33, %v838_v32  ;;  %v1020_v39 = vld [vmem:[%s1439_s1 + $0x34] sm:$0xf0]  ;;  %v1018_v40 = vld [vmem:[%s1439_s1 + $0x2c] sm:$0xf]  ;;  %v843_v42 = vor.u32 %v1013_v35, %v840_v36 }
   0xc   :  { %185 = vmatpush.bf16.msra.mxu3 %v807_v24  ;;  %v864_v41 = vld [vmem:[%s1439_s1 + $0x38] sm:$0xf0]  ;;  %v863_v43 = vor.u32 %v1020_v39, %v862_v37  ;;  %v846_v45 = vld [vmem:[%s1439_s1 + $0x8] sm:$0xf]  ;;  %v1016_v46 = vld [vmem:[%s1439_s1 + $0x14] sm:$0xf0] }
   0xd   :  { %v867_v44 = vor.u32 %v1018_v40, %v864_v41  ;;  %v1014_v47 = vld [vmem:[%s1439_s1 + $0xc] sm:$0xf]  ;;  %v848_v48 = vld [vmem:[%s1439_s1 + $0x18] sm:$0xf0]  ;;  %v847_v49 = vor.u32 %v1016_v46, %v846_v45  ;;  %v1009_v56 = vld [vmem:[%s1438_s0] sm:$0xff]  ;;  %s767_s10 = sshll.u32 %s1445_s7, 4  ;;  %s768_s10 = int_to_ptr.hbm [resolvable:$true] %s767_s10 }
   0xe   :  { %199 = vmatpush.bf16.msrb.mxu0 %v811_v26  ;;  %v851_v50 = vor.u32 %v1014_v47, %v848_v48  ;;  %v1037_v57 = vld [vmem:[%s1442_s4 + $0x38] sm:$0xff]  ;;  %v1036_v60 = vld [vmem:[%s1442_s4 + $0x30] sm:$0xff]  ;;  %v1035_v1 = vld [vmem:[%s1442_s4 + $0x28] sm:$0xff]  ;;  %s1111_s11 = smov 64   ;;  %s1112_s12 = smov 4  }
   0xf   :  { %260 = vmatpush.bf16.msrb.mxu1 %v855_v30  ;;  %274 = vmatpush.bf16.msrb.mxu2 %v859_v34  ;;  %v1053_v58 = vld [vmem:[%s1443_s5 + $0x38] sm:$0xff]  ;;  %v1052_v61 = vld [vmem:[%s1443_s5 + $0x30] sm:$0xff]  ;;  %v1051_v2 = vld [vmem:[%s1443_s5 + $0x28] sm:$0xff] }
  0x10   :  { %288 = vmatpush.bf16.msrb.mxu3 %v863_v43  ;;  %v1045_v62 = vld [vmem:[%s1442_s4 + $0x78] sm:$0xff]  ;;  %v1044_v4 = vld [vmem:[%s1442_s4 + $0x70] sm:$0xff]  ;;  %v1034_v6 = vld [vmem:[%s1442_s4 + $0x20] sm:$0xff] }
  0x11   :  { %v1061_v63 = vld [vmem:[%s1443_s5 + $0x78] sm:$0xff]  ;;  %v1060_v5 = vld [vmem:[%s1443_s5 + $0x70] sm:$0xff]  ;;  %v1050_v7 = vld [vmem:[%s1443_s5 + $0x20] sm:$0xff] }
  0x12   :  { %302 = vmatpush.bf16.msra.mxu0 %v867_v44  ;;  %v1043_v8 = vld [vmem:[%s1442_s4 + $0x68] sm:$0xff]  ;;  %v1033_v11 = vld [vmem:[%s1442_s4 + $0x18] sm:$0xff]  ;;  %v1042_v14 = vld [vmem:[%s1442_s4 + $0x60] sm:$0xff] }
  0x13   :  { %261 = vmatpush.bf16.msrb.mxu1 %v839_v38  ;;  %275 = vmatpush.bf16.msrb.mxu2 %v843_v42  ;;  %v1059_v9 = vld [vmem:[%s1443_s5 + $0x68] sm:$0xff]  ;;  %v1049_v12 = vld [vmem:[%s1443_s5 + $0x18] sm:$0xff]  ;;  %v1058_v15 = vld [vmem:[%s1443_s5 + $0x60] sm:$0xff] }
  0x14   :  { %289 = vmatpush.bf16.msrb.mxu3 %v847_v49  ;;  %v1032_v17 = vld [vmem:[%s1442_s4 + $0x10] sm:$0xff]  ;;  %v1041_v20 = vld [vmem:[%s1442_s4 + $0x58] sm:$0xff]  ;;  %v1031_v23 = vld [vmem:[%s1442_s4 + $0x8] sm:$0xff] }
  0x15   :  { %v1048_v18 = vld [vmem:[%s1443_s5 + $0x10] sm:$0xff]  ;;  %v1057_v21 = vld [vmem:[%s1443_s5 + $0x58] sm:$0xff]  ;;  %v1047_v24 = vld [vmem:[%s1443_s5 + $0x8] sm:$0xff] }
  0x16   :  { %303 = vmatpush.bf16.msra.mxu0 %v851_v50  ;;  %v1040_v28 = vld [vmem:[%s1442_s4 + $0x50] sm:$0xff]  ;;  %v1030_v32 = vld [vmem:[%s1442_s4] sm:$0xff]  ;;  %v1039_v38 = vld [vmem:[%s1442_s4 + $0x48] sm:$0xff] }
  0x17   :  { %v1056_v29 = vld [vmem:[%s1443_s5 + $0x50] sm:$0xff]  ;;  %v1046_v33 = vld [vmem:[%s1443_s5] sm:$0xff]  ;;  %v1055_v39 = vld [vmem:[%s1443_s5 + $0x48] sm:$0xff] }
  0x18   :  { %v1038_v42 = vld [vmem:[%s1442_s4 + $0x40] sm:$0xff] }
  0x19   :  { %v1054_v43 = vld [vmem:[%s1443_s5 + $0x40] sm:$0xff] }
  0x86   :  { %v68_v51 = vpop.f32.mrf.mxu0 }
  0x87   :  { %v73_v52 = vpack.c.bf16 %v68_v51, %v68_v51 }
  0x89   :  { %76 = vst.msk [vmem:[#allocation4] sm:$0xf] %vm75_vm1, %v73_v52 }
  0x8e   :  { %v70_v53 = vpop.f32.mrf.mxu0 }
  0x8f   :  { %v74_v54 = vpack.c.bf16 %v70_v53, %v70_v53 }
  0x91   :  { %77 = vst.msk [vmem:[#allocation4 + $0x4] sm:$0xf] %vm75_vm1, %v74_v54 }
  0x98   :  { %v1021_v55 = vld [vmem:[#allocation4] sm:$0xff] }
  0x99   :  { %828 = vmatmul.msk.bf16.vlgmr.msra.gmra.mxu1 %vm55_vm0, %v1021_v55  ;;  %829 = vmatmul.msk.bf16.vlgmr.msra.gmra.mxu2 %vm55_vm0, %v1021_v55 }
  0x9a   :  { %830 = vmatmul.msk.bf16.vlgmr.msra.gmra.mxu3 %vm55_vm0, %v1021_v55  ;;  %831 = vmatmul.msk.bf16.vlgmr.msrb.gmra.mxu0 %vm55_vm0, %v1021_v55 }
  0x9b   :  { %526 = vmatpush.bf16.msra.mxu1 %v1037_v57  ;;  %688 = vmatpush.bf16.msra.mxu3 %v1053_v58 }
  0x9c   :  { %540 = vmatpush.bf16.msra.mxu2 %v1045_v62  ;;  %702 = vmatpush.bf16.msrb.mxu0 %v1061_v63 }
  0x9f   :  { %527 = vmatpush.bf16.msra.mxu1 %v1036_v60  ;;  %689 = vmatpush.bf16.msra.mxu3 %v1052_v61 }
  0xa0   :  { %541 = vmatpush.bf16.msra.mxu2 %v1044_v4  ;;  %703 = vmatpush.bf16.msrb.mxu0 %v1060_v5 }
  0xa3   :  { %528 = vmatpush.bf16.msra.mxu1 %v1035_v1  ;;  %690 = vmatpush.bf16.msra.mxu3 %v1051_v2 }
  0xa4   :  { %542 = vmatpush.bf16.msra.mxu2 %v1043_v8  ;;  %704 = vmatpush.bf16.msrb.mxu0 %v1059_v9 }
  0xa7   :  { %529 = vmatpush.bf16.msra.mxu1 %v1034_v6  ;;  %691 = vmatpush.bf16.msra.mxu3 %v1050_v7 }
  0xa8   :  { %543 = vmatpush.bf16.msra.mxu2 %v1042_v14  ;;  %705 = vmatpush.bf16.msrb.mxu0 %v1058_v15 }
  0xa9   :  { %868 = vmatmul.msk.bf16.vlgmr.msrb.gmra.mxu1 %vm55_vm0, %v1009_v56  ;;  %869 = vmatmul.msk.bf16.vlgmr.msrb.gmra.mxu2 %vm55_vm0, %v1009_v56 }
  0xaa   :  { %870 = vmatmul.msk.bf16.vlgmr.msrb.gmra.mxu3 %vm55_vm0, %v1009_v56  ;;  %871 = vmatmul.msk.bf16.vlgmr.msra.gmra.mxu0 %vm55_vm0, %v1009_v56 }
  0xab   :  { %530 = vmatpush.bf16.msra.mxu1 %v1033_v11  ;;  %692 = vmatpush.bf16.msra.mxu3 %v1049_v12 }
  0xac   :  { %544 = vmatpush.bf16.msra.mxu2 %v1041_v20  ;;  %706 = vmatpush.bf16.msrb.mxu0 %v1057_v21 }
  0xaf   :  { %531 = vmatpush.bf16.msra.mxu1 %v1032_v17  ;;  %693 = vmatpush.bf16.msra.mxu3 %v1048_v18 }
  0xb0   :  { %545 = vmatpush.bf16.msra.mxu2 %v1040_v28  ;;  %707 = vmatpush.bf16.msrb.mxu0 %v1056_v29 }
  0xb3   :  { %532 = vmatpush.bf16.msra.mxu1 %v1031_v23  ;;  %694 = vmatpush.bf16.msra.mxu3 %v1047_v24 }
  0xb4   :  { %546 = vmatpush.bf16.msra.mxu2 %v1039_v38  ;;  %708 = vmatpush.bf16.msrb.mxu0 %v1055_v39 }
  0xb7   :  { %533 = vmatpush.bf16.msra.mxu1 %v1030_v32  ;;  %695 = vmatpush.bf16.msra.mxu3 %v1046_v33 }
  0xb8   :  { %547 = vmatpush.bf16.msra.mxu2 %v1038_v42  ;;  %709 = vmatpush.bf16.msrb.mxu0 %v1054_v43 }
 0x116   :  { %v159_v59 = vpop.f32.mrf.mxu1 }
 0x117   :  { %v1367_v36 = vpop.f32.mrf.mxu0 }
 0x11c   :  { %v173_v0 = vpop.f32.mrf.mxu2 }
 0x11d   :  { %v1347_v25 = vpop.f32.mrf.mxu3 }
 0x11e   :  { %v161_v3 = vpop.f32.mrf.mxu1 }
 0x11f   :  { %v1386_v52 = vpop.f32.mrf.mxu0 }
 0x124   :  { %v175_v10 = vpop.f32.mrf.mxu2 }
 0x125   :  { %v1383_v45 = vpop.f32.mrf.mxu3 }
 0x126   :  { %v263_v13 = vpop.f32.mrf.mxu1 }
 0x127   :  { %v1326_v16 = vadd.f32 %v263_v13, %v159_v59  ;;  %v305_v6 = vpop.f32.mrf.mxu0 }
 0x129   :  { %v872_v19 = vmul.f32 -1.442695, %v1326_v16 }
 0x12b   :  { %1067 = vpow2.f32 %v872_v19 }
 0x12c   :  { %v277_v22 = vpop.f32.mrf.mxu2 }
 0x12d   :  { %v1349_v26 = vadd.f32 %v277_v22, %v173_v0  ;;  %v291_v59 = vpop.f32.mrf.mxu3 }
 0x12e   :  { %v265_v27 = vpop.f32.mrf.mxu1 }
 0x12f   :  { %v873_v30 = vmul.f32 -1.442695, %v1349_v26  ;;  %v1358_v31 = vadd.f32 %v265_v27, %v161_v3  ;;  %v307_v42 = vpop.f32.mrf.mxu0 }
 0x131   :  { %v1068_v34 = vpop.eup %1067  ;;  %1069 = vpow2.f32 %v873_v30  ;;  %v874_v35 = vmul.f32 -1.442695, %v1358_v31 }
 0x132   :  { %v322_v37 = vadd.f32 1.0, %v1068_v34 }
 0x133   :  { %1071 = vpow2.f32 %v874_v35 }
 0x134   :  { %1073 = vrcp.f32 %v322_v37  ;;  %v279_v40 = vpop.f32.mrf.mxu2  ;;  %v337_v61 = vand.u32 2147483648, %v322_v37  ;;  %vm331_vm3 = vweird.f32 %v322_v37  ;;  %v335_v0 = vand.u32 2147483647, %v322_v37 }
 0x135   :  { %v1375_v41 = vadd.f32 %v279_v40, %v175_v10  ;;  %v293_v27 = vpop.f32.mrf.mxu3 }
 0x136   :  { %v338_v5 = vor.u32 1.1754944e-38, %v337_v61  ;;  %vm336_vm6 = vcmp.eq.f32.partialorder %v335_v0, 8.507059e+37  ;;  %v294_v39 = vadd.f32 %v293_v27, %v1383_v45 }
 0x137   :  { %v1070_v44 = vpop.eup %1069  ;;  %v875_v46 = vmul.f32 -1.442695, %v1375_v41 }
 0x138   :  { %v323_v47 = vadd.f32 1.0, %v1070_v44 }
 0x139   :  { %v1072_v48 = vpop.eup %1071  ;;  %1075 = vpow2.f32 %v875_v46 }
 0x13a   :  { %v1074_v49 = vpop.eup %1073  ;;  %1077 = vrcp.f32 %v323_v47  ;;  %v324_v51 = vadd.f32 1.0, %v1072_v48  ;;  %v350_v7 = vand.u32 2147483647, %v323_v47  ;;  %v352_v10 = vand.u32 2147483648, %v323_v47 }
 0x13b   :  { %v327_v50 = vmul.f32 %v1074_v49, %v322_v37  ;;  %vm332_vm2 = vweird.f32 %v1074_v49  ;;  %vm346_vm8 = vweird.f32 %v323_v47  ;;  %v292_v37 = vadd.f32 %v291_v59, %v1347_v25 }
 0x13c   :  { %1079 = vrcp.f32 %v324_v51  ;;  %vm1391_vm4 = vmor %vm331_vm3, %vm332_vm2  ;;  %v367_v11 = vand.u32 2147483648, %v324_v51  ;;  %v365_v14 = vand.u32 2147483647, %v324_v51  ;;  %vm1402_vm10 = vcmp.eq.f32.partialorder %v350_v7, 8.507059e+37 }
 0x13d   :  { %v328_v53 = vsub.f32 1.0, %v327_v50  ;;  %vm361_vm11 = vweird.f32 %v324_v51  ;;  %v353_v22 = vor.u32 1.1754944e-38, %v352_v10  ;;  %v306_v25 = vadd.f32 %v305_v6, %v1367_v36 }
 0x13e   :  { %v368_v23 = vor.u32 1.1754944e-38, %v367_v11  ;;  %vm366_vm13 = vcmp.eq.f32.partialorder %v365_v14, 8.507059e+37 }
 0x13f   :  { %v1076_v54 = vpop.eup %1075  ;;  %v329_v55 = vmul.f32 %v1074_v49, %v328_v53 }
 0x140   :  { %v1078_v56 = vpop.eup %1077  ;;  %v1388_v57 = vadd.f32 1.0, %v1076_v54  ;;  %v1109_v54 = vmov 0.0  }
 0x141   :  { %v342_v58 = vmul.f32 %v1078_v56, %v323_v47  ;;  %v330_v60 = vadd.f32 %v1074_v49, %v329_v55  ;;  %vm347_vm5 = vweird.f32 %v1078_v56  ;;  %78 = vst.msk [vmem:[#allocation2] sm:$0xff] %vm55_vm0, %v1109_v54 }
 0x142   :  { %1081 = vrcp.f32 %v1388_v57  ;;  %v1080_v62 = vpop.eup %1079  ;;  %vm1398_vm9 = vmor %vm346_vm8, %vm347_vm5  ;;  %v382_v30 = vand.u32 2147483648, %v1388_v57  ;;  %v380_v34 = vand.u32 2147483647, %v1388_v57  ;;  %vm376_vm15 = vweird.f32 %v1388_v57  ;;  %79 = vst.msk [vmem:[#allocation2 + $0x8] sm:$0xff] %vm55_vm0, %v1109_v54 }
 0x143   :  { %v343_v63 = vsub.f32 1.0, %v342_v58  ;;  %v357_v1 = vmul.f32 %v1080_v62, %v324_v51  ;;  %v334_v4 = vsel %vm1391_vm4, %v1074_v49, %v330_v60  ;;  %vm362_vm7 = vweird.f32 %v1080_v62 }
 0x144   :  { %v339_v15 = vsel %vm336_vm6, %v338_v5, %v334_v4  ;;  %vm363_vm12 = vmor %vm361_vm11, %vm362_vm7  ;;  %v383_v43 = vor.u32 1.1754944e-38, %v382_v30  ;;  %vm381_vm3 = vcmp.eq.f32.partialorder %v380_v34, 8.507059e+37  ;;  %vm80_vm4 = vcmask 130048  }
 0x145   :  { %v344_v3 = vmul.f32 %v1078_v56, %v343_v63  ;;  %v358_v8 = vsub.f32 1.0, %v357_v1  ;;  %v386_v28 = vmul.f32 %v339_v15, %v1326_v16  ;;  %81 = vst.msk [vmem:[#allocation3] sm:$0xff] %vm80_vm4, %v1109_v54 }
 0x146   :  { %82 = vst.msk [vmem:[#allocation3 + $0x8] sm:$0xff] %vm80_vm4, %v1109_v54 }
 0x147   :  { %v345_v9 = vadd.f32 %v1078_v56, %v344_v3  ;;  %v359_v13 = vmul.f32 %v1080_v62, %v358_v8  ;;  %v390_v16 = vmul.f32 %v386_v28, %v292_v37 }
 0x148   :  { %v1082_v12 = vpop.eup %1081  ;;  %v396_v58 = vld [vmem:[#allocation2] sm:$0xff] }
 0x149   :  { %v372_v17 = vmul.f32 %v1082_v12, %v1388_v57  ;;  %v360_v20 = vadd.f32 %v1080_v62, %v359_v13  ;;  %v349_v21 = vsel %vm1398_vm9, %v1078_v56, %v345_v9  ;;  %vm377_vm14 = vweird.f32 %v1082_v12  ;;  %v397_v4 = vld [vmem:[#allocation2 + $0x8] sm:$0xff] }
 0x14a   :  { %v354_v35 = vsel %vm1402_vm10, %v353_v22, %v349_v21  ;;  %vm378_vm2 = vmor %vm376_vm15, %vm377_vm14 }
 0x14b   :  { %v373_v24 = vsub.f32 1.0, %v372_v17  ;;  %v364_v29 = vsel %vm363_vm12, %v1080_v62, %v360_v20  ;;  %v387_v46 = vmul.f32 %v354_v35, %v1349_v26  ;;  %v1062_v26 = vld [vmem:[%s1444_s6] sm:$0xff]  ;;  %s1110_s6 = smov [#allocation5]  }
 0x14c   :  { %v369_v32 = vsel %vm366_vm13, %v368_v23, %v364_v29  ;;  %745 = vmatpush.bf16.msrb.mxu1 %v1062_v26  ;;  %s765_s30 = sshll.u32 %s1110_s6, 4  ;;  %s766_s30 = int_to_ptr.vmem [resolvable:$true] %s765_s30 }
 0x14d   :  { %v374_v33 = vmul.f32 %v1082_v12, %v373_v24  ;;  %v388_v38 = vmul.f32 %v369_v32, %v1358_v31  ;;  %v308_v31 = vadd.f32 %v307_v42, %v1386_v52  ;;  %v391_v50 = vmul.f32 %v387_v46, %v306_v25  ;;  %v558_v52 = vld [vmem:[#allocation3] sm:$0xff]  ;;  %v559_v0 = vld [vmem:[#allocation3 + $0x8] sm:$0xff] }
 0x14f   :  { %v375_v40 = vadd.f32 %v1082_v12, %v374_v33  ;;  %v392_v44 = vmul.f32 %v388_v38, %v294_v39 }
 0x151   :  { %v379_v47 = vsel %vm378_vm2, %v1082_v12, %v375_v40  ;;  %v394_v49 = vpack.c.bf16 %v392_v44, %v390_v16 }
 0x152   :  { %v384_v48 = vsel %vm381_vm3, %v383_v43, %v379_v47 }
 0x153   :  { %v389_v45 = vmul.f32 %v384_v48, %v1375_v41  ;;  %534 = vmatmul.bf16.vlgmr.msra.gmra.mxu1 %v394_v49  ;;  %696 = vmatmul.bf16.vlgmr.msra.gmra.mxu3 %v394_v49 }
 0x155   :  { %v393_v51 = vmul.f32 %v389_v45, %v308_v31 }
 0x157   :  { %v395_v53 = vpack.c.bf16 %v393_v51, %v391_v50 }
 0x159   :  { %548 = vmatmul.bf16.vlgmr.msra.gmra.mxu2 %v395_v53  ;;  %710 = vmatmul.bf16.vlgmr.msrb.gmra.mxu0 %v395_v53 }
 0x1d0   :  { %v535_v56 = vpop.f32.mrf.mxu1 }
 0x1d6   :  { %v711_v36 = vpop.f32.mrf.mxu0  ;;  %v697_v41 = vpop.f32.mrf.mxu3 }
 0x1d7   :  { %v712_v55 = vadd.f32 %v711_v36, %v697_v41 }
 0x1d8   :  { %v537_v3 = vpop.f32.mrf.mxu1 }
 0x1d9   :  { %v716_v57 = vadd.f32 %v712_v55, %v558_v52 }
 0x1db   :  { %719 = vst.msk [vmem:[#allocation3] sm:$0xff] %vm80_vm4, %v716_v57 }
 0x1dc   :  { %v549_v59 = vpop.f32.mrf.mxu2 }
 0x1dd   :  { %v550_v60 = vadd.f32 %v549_v59, %v535_v56 }
 0x1de   :  { %v713_v61 = vpop.f32.mrf.mxu0  ;;  %v699_v63 = vpop.f32.mrf.mxu3 }
 0x1df   :  { %v554_v62 = vadd.f32 %v550_v60, %v396_v58  ;;  %v714_v1 = vadd.f32 %v713_v61, %v699_v63 }
 0x1e1   :  { %556 = vst.msk [vmem:[#allocation2] sm:$0xff] %vm55_vm0, %v554_v62  ;;  %v717_v2 = vadd.f32 %v714_v1, %v559_v0 }
 0x1e2   :  { %v724_v8 = vld [vmem:[#allocation3] sm:$0xff] }
 0x1e3   :  { %720 = vst.msk [vmem:[#allocation3 + $0x8] sm:$0xff] %vm80_vm4, %v717_v2 }
 0x1e4   :  { %v551_v5 = vpop.f32.mrf.mxu2 }
 0x1e5   :  { %v552_v6 = vadd.f32 %v551_v5, %v537_v3 }
 0x1e7   :  { %v555_v7 = vadd.f32 %v552_v6, %v397_v4 }
 0x1e8   :  { %v752_v12 = vld [vmem:[#allocation2] sm:$0xff] }
 0x1e9   :  { %557 = vst.msk [vmem:[#allocation2 + $0x8] sm:$0xff] %vm55_vm0, %v555_v7 }
 0x1ea   :  { %v725_v9 = vld [vmem:[#allocation3 + $0x8] sm:$0xff] }
 0x1eb   :  { %v726_v10 = vpack.c.bf16 %v725_v9, %v724_v8 }
 0x1ed   :  { %1008 = vmatmul.msk.bf16.vlgmr.msrb.gmra.mxu1 %vm80_vm4, %v726_v10 }
 0x1f0   :  { %v753_v17 = vld [vmem:[#allocation2 + $0x8] sm:$0xff] }
 0x26a   :  { %v747_v11 = vpop.f32.mrf.mxu1 }
 0x26b   :  { %v754_v13 = vadd.f32 %v752_v12, %v747_v11 }
 0x26d   :  { %v756_v14 = vpack.c.bf16 %v754_v13, %v754_v13 }
 0x26f   :  { %759 = vst.msk [vmem:[#allocation5] sm:$0xf] %vm75_vm1, %v756_v14 }
 0x272   :  { %v749_v15 = vpop.f32.mrf.mxu1 }
 0x273   :  { %v755_v18 = vadd.f32 %v753_v17, %v749_v15 }
 0x275   :  { %v757_v19 = vpack.c.bf16 %v755_v18, %v755_v18 }
 0x277   :  { %760 = vst.msk [vmem:[#allocation5 + $0x4] sm:$0xf] %vm75_vm1, %v757_v19 }
 0x278   :  { %773 = dma.vmem_to_hbm [thread:$0]  %s766_s30, 128, %s768_s10, [#allocation6], %s1111_s11, %s1111_s11, %s1112_s12  }
 0x279   :  { %1107 = dma.done.wait [#allocation6], 128  }
 0x27a   :  { %1108 = vsyncadd [#allocation6], 4294967168 }
 0x27b   :  { %778 = vsyncpa [#allocation6], 1 }

</bundles_post_ra>
